<compile_context>
chip_gen: v7x
topology: tpu7x:2x2x1
jax: 0.10.0
libtpu: 0.0.40
codegen_flags: <defaults>
</compile_context>

<pallas_src>
import functools

import jax
import jax.numpy as jnp
from jax.experimental import pallas as pl
from jax.experimental.pallas import tpu as pltpu

_LANE = 128
# Row quantum keeps the BlockSpec legal for f32 (8), bf16 (16) and int8/bool
# (32) sublane tiling alike.
_ROW_QUANTUM = 32
# Rows per inner-loop iteration: 256 rows x 128 lanes = 32 vregs of y per
# step -> plenty of work to amortize loop overhead while bounding elementwise
# temporaries.
_CHUNK_ROWS = 256


def _round_up(x, m):
    return (x + m - 1) // m * m


def _vmem_plan():
    """Returns (byte budget for double-buffered input blocks, vmem_limit_bytes)."""
    kind = ""
    try:
        kind = jax.devices()[0].device_kind.lower()
    except Exception:
        pass
    if any(tag in kind for tag in ("v6", "v7", "tpu7")):
        # Newer generations: 32 MiB default scoped VMEM, fast HBM -> big blocks.
        return 24 << 20, 32 << 20
    # v5e and older: stay comfortably inside the 16 MiB default scoped VMEM.
    return 10 << 20, None


def _diff_dp_kernel(y_ref, s_ref, part_ref, *, rows, blk_rows, chunk_rows):
    i = pl.program_id(0)
    n_chunks = blk_rows // chunk_rows
    zero = jnp.zeros((8, _LANE), jnp.float32)

    def fold(x):
        # (chunk_rows, 128) -> (8, 128) with full-vreg adds only (no XLU work).
        return jnp.sum(x.reshape(chunk_rows // 8, 8, _LANE), axis=0)

    def make_body(masked):
        def body(c, carry):
            s0a, c0a, s1a, c1a = carry
            r0 = pl.multiple_of(c * chunk_rows, chunk_rows)
            y = y_ref[pl.ds(r0, chunk_rows), :].astype(jnp.float32)
            s = s_ref[pl.ds(r0, chunk_rows), :]
            m0 = s == 0
            m1 = s == 1
            if masked:
                # Only the block-row overhang needs masking; the lane tail of
                # the last valid row already carries a sentinel s (== 2).
                rid = jax.lax.broadcasted_iota(jnp.int32, (chunk_rows, _LANE), 0)
                valid = rid + (i * blk_rows + r0) < rows
                m0 = jnp.logical_and(valid, m0)
                m1 = jnp.logical_and(valid, m1)
            # jnp.where (not multiply): garbage/NaN bits in the overhang region
            # can never poison the partial sums.
            s0a = s0a + fold(jnp.where(m0, y, 0.0))
            c0a = c0a + fold(m0.astype(jnp.float32))
            s1a = s1a + fold(jnp.where(m1, y, 0.0))
            c1a = c1a + fold(m1.astype(jnp.float32))
            return s0a, c0a, s1a, c1a

        return body

    def run(masked):
        s0a, c0a, s1a, c1a = jax.lax.fori_loop(
            0, n_chunks, make_body(masked), (zero, zero, zero, zero))
        part_ref[0, 0] = s0a
        part_ref[0, 1] = c0a
        part_ref[0, 2] = s1a
        part_ref[0, 3] = c1a

    is_last = i == pl.num_programs(0) - 1

    @pl.when(jnp.logical_not(is_last))
    def _():
        run(masked=False)  # fast path: no validity mask at all

    @pl.when(is_last)
    def _():
        run(masked=True)   # slow path: row-mask the block overhang


def diff_dp(y_pred, s):
    """Pallas implementation of DiffDP.forward(y_pred, s). Returns a scalar."""
    y = y_pred.reshape(-1)
    sv = s.reshape(-1)
    if sv.dtype == jnp.bool_:
        sv = sv.astype(jnp.int8)  # keep s narrow; avoid i1 storage quirks

    n = y.shape[0]

    # Pad only up to the next lane multiple (no-op for lane-aligned inputs).
    # s's pad uses a sentinel outside {0,1} so padded positions fall in
    # neither group -> the kernel never needs a per-lane index mask.
    rem = n % _LANE
    if rem:
        pad = _LANE - rem
        y = jnp.pad(y, (0, pad))
        sv = jnp.pad(sv, (0, pad), constant_values=2)

    rows = y.shape[0] // _LANE
    y2 = y.reshape(rows, _LANE)
    s2 = sv.reshape(rows, _LANE)

    budget_bytes, vmem_limit = _vmem_plan()
    bytes_per_row = _LANE * (y2.dtype.itemsize + s2.dtype.itemsize)
    budget_rows = budget_bytes // (2 * bytes_per_row)  # 2x: double buffering

    rows_q = _round_up(rows, _ROW_QUANTUM)
    if rows_q <= _CHUNK_ROWS:
        blk_rows = rows_q
        chunk_rows = rows_q
    else:
        chunk_rows = _CHUNK_ROWS
        budget_rows_q = max(chunk_rows, budget_rows // chunk_rows * chunk_rows)
        blk_rows = min(_round_up(rows_q, chunk_rows), budget_rows_q)

    num_blocks = pl.cdiv(rows, blk_rows)

    kernel = functools.partial(
        _diff_dp_kernel, rows=rows, blk_rows=blk_rows, chunk_rows=chunk_rows)

    cp_kwargs = dict(dimension_semantics=("parallel",))
    if vmem_limit is not None:
        cp_kwargs["vmem_limit_bytes"] = vmem_limit

    out_bytes = num_blocks * 4 * 8 * _LANE * 4
    in_bytes = (y2.size * y2.dtype.itemsize) + (s2.size * s2.dtype.itemsize)

    parts = pl.pallas_call(
        kernel,
        out_shape=jax.ShapeDtypeStruct((num_blocks, 4, 8, _LANE), jnp.float32),
        grid_spec=pltpu.PrefetchScalarGridSpec(
            num_scalar_prefetch=0,
            grid=(num_blocks,),
            in_specs=[
                pl.BlockSpec((blk_rows, _LANE), lambda i: (i, 0)),
                pl.BlockSpec((blk_rows, _LANE), lambda i: (i, 0)),
            ],
            out_specs=pl.BlockSpec((1, 4, 8, _LANE), lambda i: (i, 0, 0, 0)),
        ),
        compiler_params=pltpu.CompilerParams(**cp_kwargs),
        cost_estimate=pl.CostEstimate(
            flops=8 * n,
            transcendentals=0,
            bytes_accessed=int(in_bytes + out_bytes),
        ),
    )(y2, s2)

    # Tiny final cross-lane reduction over the per-block partials.
    sums = jnp.sum(parts, axis=(0, 2, 3))  # (4,): [sum0, cnt0, sum1, cnt1]
    mean0 = sums[0] / sums[1]  # NaN if a group is empty (matches torch.mean
    mean1 = sums[2] / sums[3]  # of an empty tensor in the reference)
    return jnp.abs(mean0 - mean1)


def diff_dp_ref(y_pred, s):
    """Pure-JAX reference (matches the PyTorch module)."""
    y = y_pred.reshape(-1).astype(jnp.float32)
    sv = s.reshape(-1).astype(jnp.float32)
    m0 = (sv == 0.0).astype(jnp.float32)
    m1 = (sv == 1.0).astype(jnp.float32)
    mean0 = jnp.sum(y * m0) / jnp.sum(m0)
    mean1 = jnp.sum(y * m1) / jnp.sum(m1)
    return jnp.abs(mean0 - mean1)


if __name__ == "__main__":
    key = jax.random.PRNGKey(0)
    ky, ks, ky2, ks2 = jax.random.split(key, 4)

    # Main example: predictions over a 2x4x16x16 tensor, binary sensitive
    # attribute s of the same shape (values in {0, 1}), both f32.
    y_pred = jax.random.normal(ky, (2, 4, 16, 16), dtype=jnp.float32)
    s = jax.random.bernoulli(ks, 0.5, (2, 4, 16, 16)).astype(jnp.float32)

    loss = jax.block_until_ready(diff_dp(y_pred, s))
    ref = diff_dp_ref(y_pred, s)
    assert jnp.allclose(loss, ref, rtol=1e-5, atol=1e-6), (loss, ref)

    # Ragged / non-lane-aligned shape with narrow (bool) s: exercises the
    # sentinel lane padding and the last-block row mask.
    y_small = jax.random.normal(ky2, (3, 41), dtype=jnp.float32)
    s_small = jax.random.bernoulli(ks2, 0.4, (3, 41))  # bool
    loss2 = jax.block_until_ready(diff_dp(y_small, s_small))
    ref2 = diff_dp_ref(y_small, s_small)
    assert jnp.allclose(loss2, ref2, rtol=1e-5, atol=1e-6), (loss2, ref2)

    print("KERNEL_OK")
</pallas_src>

<mosaic_0001>
module attributes {stable_mosaic.version = 11 : i64} {
  func.func @_diff_dp_kernel(%arg0: i32, %arg1: memref<32x128xf32, #tpu.memory_space<vmem>>, %arg2: memref<32x128xf32, #tpu.memory_space<vmem>>, %arg3: memref<1x4x8x128xf32, #tpu.memory_space<vmem>>) attributes {dimension_semantics = [#tpu.dimension_semantics<parallel>], iteration_bounds = array<i64: 1>, scalar_prefetch = 0 : i64, scratch_operands = 0 : i64, tpu.core_type = #tpu.core_type<tc>, window_params = [{transform_indices = @transform_0, window_bounds = array<i64: 32, 128>}, {transform_indices = @transform_1, window_bounds = array<i64: 32, 128>}, {transform_indices = @transform_2, window_bounds = array<i64: 1, 4, 8, 128>}]} {
    %cst = arith.constant 0.000000e+00 : f32
    %0 = vector.broadcast %cst : f32 to vector<8x128xf32>
    %c0_i32 = arith.constant 0 : i32
    %1 = arith.cmpi eq, %arg0, %c0_i32 : i32
    %true = arith.constant true
    %2 = arith.xori %1, %true : i1
    %3 = arith.extui %2 : i1 to i32
    %c0_i32_0 = arith.constant 0 : i32
    %4 = arith.cmpi ne, %3, %c0_i32_0 : i32
    scf.if %4 {
      %c0_i32_2 = arith.constant 0 : i32
      %c32_i32 = arith.constant 32 : i32
      %7 = arith.muli %c0_i32_2, %c32_i32 : i32
      %8 = tpu.assume_multiple %7, 32 : i32
      %9 = arith.index_cast %8 : i32 to index
      %c0 = arith.constant 0 : index
      %10 = vector.load %arg1[%9, %c0] : memref<32x128xf32, #tpu.memory_space<vmem>>, vector<32x128xf32>
      %11 = arith.index_cast %8 : i32 to index
      %c0_3 = arith.constant 0 : index
      %12 = vector.load %arg2[%11, %c0_3] : memref<32x128xf32, #tpu.memory_space<vmem>>, vector<32x128xf32>
      %cst_4 = arith.constant 0.000000e+00 : f32
      %13 = vector.broadcast %cst_4 : f32 to vector<32x128xf32>
      %14 = arith.cmpf oeq, %12, %13 : vector<32x128xf32>
      %cst_5 = arith.constant 1.000000e+00 : f32
      %15 = vector.broadcast %cst_5 : f32 to vector<32x128xf32>
      %16 = arith.cmpf oeq, %12, %15 : vector<32x128xf32>
      %cst_6 = arith.constant 0.000000e+00 : f32
      %17 = vector.broadcast %cst_6 : f32 to vector<32x128xf32>
      %18 = arith.select %14, %10, %17 : vector<32x128xi1>, vector<32x128xf32>
      %19 = vector.shape_cast %18 : vector<32x128xf32> to vector<4x8x128xf32>
      %cst_7 = arith.constant dense<0.000000e+00> : vector<8x128xf32>
      %20 = vector.multi_reduction <add>, %19, %cst_7 [0] : vector<4x8x128xf32> to vector<8x128xf32>
      %21 = arith.addf %0, %20 : vector<8x128xf32>
      %22 = arith.extui %14 : vector<32x128xi1> to vector<32x128xi32>
      %23 = arith.sitofp %22 : vector<32x128xi32> to vector<32x128xf32>
      %24 = vector.shape_cast %23 : vector<32x128xf32> to vector<4x8x128xf32>
      %cst_8 = arith.constant dense<0.000000e+00> : vector<8x128xf32>
      %25 = vector.multi_reduction <add>, %24, %cst_8 [0] : vector<4x8x128xf32> to vector<8x128xf32>
      %26 = arith.addf %0, %25 : vector<8x128xf32>
      %cst_9 = arith.constant 0.000000e+00 : f32
      %27 = vector.broadcast %cst_9 : f32 to vector<32x128xf32>
      %28 = arith.select %16, %10, %27 : vector<32x128xi1>, vector<32x128xf32>
      %29 = vector.shape_cast %28 : vector<32x128xf32> to vector<4x8x128xf32>
      %cst_10 = arith.constant dense<0.000000e+00> : vector<8x128xf32>
      %30 = vector.multi_reduction <add>, %29, %cst_10 [0] : vector<4x8x128xf32> to vector<8x128xf32>
      %31 = arith.addf %0, %30 : vector<8x128xf32>
      %32 = arith.extui %16 : vector<32x128xi1> to vector<32x128xi32>
      %33 = arith.sitofp %32 : vector<32x128xi32> to vector<32x128xf32>
      %34 = vector.shape_cast %33 : vector<32x128xf32> to vector<4x8x128xf32>
      %cst_11 = arith.constant dense<0.000000e+00> : vector<8x128xf32>
      %35 = vector.multi_reduction <add>, %34, %cst_11 [0] : vector<4x8x128xf32> to vector<8x128xf32>
      %36 = arith.addf %0, %35 : vector<8x128xf32>
      %c1_i32 = arith.constant 1 : i32
      %c0_12 = arith.constant 0 : index
      %c0_13 = arith.constant 0 : index
      %c0_14 = arith.constant 0 : index
      %c0_15 = arith.constant 0 : index
      %37 = vector.load %arg3[%c0_12, %c0_13, %c0_14, %c0_15] : memref<1x4x8x128xf32, #tpu.memory_space<vmem>>, vector<1x1x8x128xf32>
      %38 = vector.shape_cast %37 : vector<1x1x8x128xf32> to vector<8x128xf32>
      %39 = vector.shape_cast %21 : vector<8x128xf32> to vector<1x1x8x128xf32>
      tpu.vector_store %arg3[%c0_12, %c0_13, %c0_14, %c0_15], %39 {strides = array<i32>} : memref<1x4x8x128xf32, #tpu.memory_space<vmem>>, vector<1x1x8x128xf32>,
      %c0_16 = arith.constant 0 : index
      %c1 = arith.constant 1 : index
      %c0_17 = arith.constant 0 : index
      %c0_18 = arith.constant 0 : index
      %40 = vector.load %arg3[%c0_16, %c1, %c0_17, %c0_18] : memref<1x4x8x128xf32, #tpu.memory_space<vmem>>, vector<1x1x8x128xf32>
      %41 = vector.shape_cast %40 : vector<1x1x8x128xf32> to vector<8x128xf32>
      %42 = vector.shape_cast %26 : vector<8x128xf32> to vector<1x1x8x128xf32>
      tpu.vector_store %arg3[%c0_16, %c1, %c0_17, %c0_18], %42 {strides = array<i32>} : memref<1x4x8x128xf32, #tpu.memory_space<vmem>>, vector<1x1x8x128xf32>,
      %c0_19 = arith.constant 0 : index
      %c2 = arith.constant 2 : index
      %c0_20 = arith.constant 0 : index
      %c0_21 = arith.constant 0 : index
      %43 = vector.load %arg3[%c0_19, %c2, %c0_20, %c0_21] : memref<1x4x8x128xf32, #tpu.memory_space<vmem>>, vector<1x1x8x128xf32>
      %44 = vector.shape_cast %43 : vector<1x1x8x128xf32> to vector<8x128xf32>
      %45 = vector.shape_cast %31 : vector<8x128xf32> to vector<1x1x8x128xf32>
      tpu.vector_store %arg3[%c0_19, %c2, %c0_20, %c0_21], %45 {strides = array<i32>} : memref<1x4x8x128xf32, #tpu.memory_space<vmem>>, vector<1x1x8x128xf32>,
      %c0_22 = arith.constant 0 : index
      %c3 = arith.constant 3 : index
      %c0_23 = arith.constant 0 : index
      %c0_24 = arith.constant 0 : index
      %46 = vector.load %arg3[%c0_22, %c3, %c0_23, %c0_24] : memref<1x4x8x128xf32, #tpu.memory_space<vmem>>, vector<1x1x8x128xf32>
      %47 = vector.shape_cast %46 : vector<1x1x8x128xf32> to vector<8x128xf32>
      %48 = vector.shape_cast %36 : vector<8x128xf32> to vector<1x1x8x128xf32>
      tpu.vector_store %arg3[%c0_22, %c3, %c0_23, %c0_24], %48 {strides = array<i32>} : memref<1x4x8x128xf32, #tpu.memory_space<vmem>>, vector<1x1x8x128xf32>,
    } else {
    }
    %5 = arith.extui %1 : i1 to i32
    %c0_i32_1 = arith.constant 0 : i32
    %6 = arith.cmpi ne, %5, %c0_i32_1 : i32
    scf.if %6 {
      %c0_i32_2 = arith.constant 0 : i32
      %c32_i32 = arith.constant 32 : i32
      %7 = arith.muli %c0_i32_2, %c32_i32 : i32
      %8 = tpu.assume_multiple %7, 32 : i32
      %9 = arith.index_cast %8 : i32 to index
      %c0 = arith.constant 0 : index
      %10 = vector.load %arg1[%9, %c0] : memref<32x128xf32, #tpu.memory_space<vmem>>, vector<32x128xf32>
      %11 = arith.index_cast %8 : i32 to index
      %c0_3 = arith.constant 0 : index
      %12 = vector.load %arg2[%11, %c0_3] : memref<32x128xf32, #tpu.memory_space<vmem>>, vector<32x128xf32>
      %cst_4 = arith.constant 0.000000e+00 : f32
      %13 = vector.broadcast %cst_4 : f32 to vector<32x128xf32>
      %14 = arith.cmpf oeq, %12, %13 : vector<32x128xf32>
      %cst_5 = arith.constant 1.000000e+00 : f32
      %15 = vector.broadcast %cst_5 : f32 to vector<32x128xf32>
      %16 = arith.cmpf oeq, %12, %15 : vector<32x128xf32>
      %17 = tpu.iota {dimensions = array<i32: 0>} : vector<32x128xi32>
      %c32_i32_6 = arith.constant 32 : i32
      %18 = arith.muli %arg0, %c32_i32_6 : i32
      %19 = arith.addi %18, %8 : i32
      %20 = vector.broadcast %19 : i32 to vector<32x128xi32>
      %21 = arith.addi %17, %20 : vector<32x128xi32>
      %c16_i32 = arith.constant 16 : i32
      %22 = vector.broadcast %c16_i32 : i32 to vector<32x128xi32>
      %23 = arith.cmpi slt, %21, %22 : vector<32x128xi32>
      %24 = arith.andi %23, %14 : vector<32x128xi1>
      %25 = arith.andi %23, %16 : vector<32x128xi1>
      %cst_7 = arith.constant 0.000000e+00 : f32
      %26 = vector.broadcast %cst_7 : f32 to vector<32x128xf32>
      %27 = arith.select %24, %10, %26 : vector<32x128xi1>, vector<32x128xf32>
      %28 = vector.shape_cast %27 : vector<32x128xf32> to vector<4x8x128xf32>
      %cst_8 = arith.constant dense<0.000000e+00> : vector<8x128xf32>
      %29 = vector.multi_reduction <add>, %28, %cst_8 [0] : vector<4x8x128xf32> to vector<8x128xf32>
      %30 = arith.addf %0, %29 : vector<8x128xf32>
      %31 = arith.extui %24 : vector<32x128xi1> to vector<32x128xi32>
      %32 = arith.sitofp %31 : vector<32x128xi32> to vector<32x128xf32>
      %33 = vector.shape_cast %32 : vector<32x128xf32> to vector<4x8x128xf32>
      %cst_9 = arith.constant dense<0.000000e+00> : vector<8x128xf32>
      %34 = vector.multi_reduction <add>, %33, %cst_9 [0] : vector<4x8x128xf32> to vector<8x128xf32>
      %35 = arith.addf %0, %34 : vector<8x128xf32>
      %cst_10 = arith.constant 0.000000e+00 : f32
      %36 = vector.broadcast %cst_10 : f32 to vector<32x128xf32>
      %37 = arith.select %25, %10, %36 : vector<32x128xi1>, vector<32x128xf32>
      %38 = vector.shape_cast %37 : vector<32x128xf32> to vector<4x8x128xf32>
      %cst_11 = arith.constant dense<0.000000e+00> : vector<8x128xf32>
      %39 = vector.multi_reduction <add>, %38, %cst_11 [0] : vector<4x8x128xf32> to vector<8x128xf32>
      %40 = arith.addf %0, %39 : vector<8x128xf32>
      %41 = arith.extui %25 : vector<32x128xi1> to vector<32x128xi32>
      %42 = arith.sitofp %41 : vector<32x128xi32> to vector<32x128xf32>
      %43 = vector.shape_cast %42 : vector<32x128xf32> to vector<4x8x128xf32>
      %cst_12 = arith.constant dense<0.000000e+00> : vector<8x128xf32>
      %44 = vector.multi_reduction <add>, %43, %cst_12 [0] : vector<4x8x128xf32> to vector<8x128xf32>
      %45 = arith.addf %0, %44 : vector<8x128xf32>
      %c1_i32 = arith.constant 1 : i32
      %c0_13 = arith.constant 0 : index
      %c0_14 = arith.constant 0 : index
      %c0_15 = arith.constant 0 : index
      %c0_16 = arith.constant 0 : index
      %46 = vector.load %arg3[%c0_13, %c0_14, %c0_15, %c0_16] : memref<1x4x8x128xf32, #tpu.memory_space<vmem>>, vector<1x1x8x128xf32>
      %47 = vector.shape_cast %46 : vector<1x1x8x128xf32> to vector<8x128xf32>
      %48 = vector.shape_cast %30 : vector<8x128xf32> to vector<1x1x8x128xf32>
      tpu.vector_store %arg3[%c0_13, %c0_14, %c0_15, %c0_16], %48 {strides = array<i32>} : memref<1x4x8x128xf32, #tpu.memory_space<vmem>>, vector<1x1x8x128xf32>,
      %c0_17 = arith.constant 0 : index
      %c1 = arith.constant 1 : index
      %c0_18 = arith.constant 0 : index
      %c0_19 = arith.constant 0 : index
      %49 = vector.load %arg3[%c0_17, %c1, %c0_18, %c0_19] : memref<1x4x8x128xf32, #tpu.memory_space<vmem>>, vector<1x1x8x128xf32>
      %50 = vector.shape_cast %49 : vector<1x1x8x128xf32> to vector<8x128xf32>
      %51 = vector.shape_cast %35 : vector<8x128xf32> to vector<1x1x8x128xf32>
      tpu.vector_store %arg3[%c0_17, %c1, %c0_18, %c0_19], %51 {strides = array<i32>} : memref<1x4x8x128xf32, #tpu.memory_space<vmem>>, vector<1x1x8x128xf32>,
      %c0_20 = arith.constant 0 : index
      %c2 = arith.constant 2 : index
      %c0_21 = arith.constant 0 : index
      %c0_22 = arith.constant 0 : index
      %52 = vector.load %arg3[%c0_20, %c2, %c0_21, %c0_22] : memref<1x4x8x128xf32, #tpu.memory_space<vmem>>, vector<1x1x8x128xf32>
      %53 = vector.shape_cast %52 : vector<1x1x8x128xf32> to vector<8x128xf32>
      %54 = vector.shape_cast %40 : vector<8x128xf32> to vector<1x1x8x128xf32>
      tpu.vector_store %arg3[%c0_20, %c2, %c0_21, %c0_22], %54 {strides = array<i32>} : memref<1x4x8x128xf32, #tpu.memory_space<vmem>>, vector<1x1x8x128xf32>,
      %c0_23 = arith.constant 0 : index
      %c3 = arith.constant 3 : index
      %c0_24 = arith.constant 0 : index
      %c0_25 = arith.constant 0 : index
      %55 = vector.load %arg3[%c0_23, %c3, %c0_24, %c0_25] : memref<1x4x8x128xf32, #tpu.memory_space<vmem>>, vector<1x1x8x128xf32>
      %56 = vector.shape_cast %55 : vector<1x1x8x128xf32> to vector<8x128xf32>
      %57 = vector.shape_cast %45 : vector<8x128xf32> to vector<1x1x8x128xf32>
      tpu.vector_store %arg3[%c0_23, %c3, %c0_24, %c0_25], %57 {strides = array<i32>} : memref<1x4x8x128xf32, #tpu.memory_space<vmem>>, vector<1x1x8x128xf32>,
    } else {
    }
    return
  }
  func.func @transform_0(%arg0: i32) -> (i32, i32) {
    %c0_i32 = arith.constant 0 : i32
    %c0_i32_0 = arith.constant 0 : i32
    return %arg0, %c0_i32 : i32, i32
  }
  func.func @transform_1(%arg0: i32) -> (i32, i32) {
    %c0_i32 = arith.constant 0 : i32
    %c0_i32_0 = arith.constant 0 : i32
    return %arg0, %c0_i32 : i32, i32
  }
  func.func @transform_2(%arg0: i32) -> (i32, i32, i32, i32) {
    %c0_i32 = arith.constant 0 : i32
    %c0_i32_0 = arith.constant 0 : i32
    %c0_i32_1 = arith.constant 0 : i32
    %c0_i32_2 = arith.constant 0 : i32
    return %arg0, %c0_i32, %c0_i32_0, %c0_i32_1 : i32, i32, i32, i32
  }
}

</mosaic_0001>

<bundles_post_ra>
// kernel: tpu_custom_call.1
= control target key start
LH: loop header
LB: loop body
LE: loop exit
PB: predicated region body
PF: predicated region fallthrough
CT: control target
= control target key end

     0   :  { %7 = vsyncpa [#allocation3], 0  ;;  %s372_s0 = inlined_call_operand.hbm [shape: f32[16,128], index: 0, kind: input, shape index: {}]   ;;  %s373_s1 = inlined_call_operand.hbm [shape: f32[16,128], index: 1, kind: input, shape index: {}]   ;;  %s374_s2 = inlined_call_operand.hbm [shape: f32[1,4,8,128], index: 2, kind: output, shape index: {}]  }
   0x1   :  { %8 = vsyncpa [#allocation6], 0 }
   0x2   :  { %9 = vsyncpa [#allocation4], 0 }
   0x3   :  { %14 = vsyncadd [#allocation3], 256  ;;  %s306_s9 = smov [#allocation2]   ;;  %s234_s13 = scalar_lea.hbm %s372_s0, 256 }
   0x4   :  { %s15_s10 = sshll.u32 %s306_s9, 4  ;;  %p235_p0 = scmp.ne.s32.totalorder %s372_s0, %s234_s13  ;;  %s16_s10 = int_to_ptr.vmem [resolvable:$true] %s15_s10 }
   0x5   :  { %p238_p1 = scmp.lt.u32.totalorder %s234_s13, %s372_s0 }
   0x7   :  { %p240_p2 = pnand %p238_p1, %p235_p0 }
   0x9   :  { %243 = shalt.err (!%p240_p2)
}
   0xa   :  { %s244_s18 = scalar_lea.vmem %s16_s10, 256  ;;  %s248_s19 = scalar_lea.vmem %s16_s10, 512 }
   0xb   :  { %p245_p3 = scmp.ne.s32.totalorder %s16_s10, %s244_s18  ;;  %p249_p4 = scmp.lt.s32.totalorder %s16_s10, %s16_s10 }
   0xc   :  { %p250_p5 = scmp.lt.s32.totalorder %s248_s19, %s244_s18 }
   0xe   :  { %p251_p6 = por %p250_p5, %p249_p4 }
  0x10   :  { %p252_p7 = pnand %p251_p6, %p245_p3 }
  0x12   :  { %255 = shalt.err (!%p252_p7)
}
  0x13   :  { %s307_s20 = smov 128   ;;  %s308_s21 = smov 8  }
  0x14   :  { %21 = dma.hbm_to_vmem [thread:$0]  %s372_s0, 256, %s16_s10, [#allocation3], %s307_s20, %s307_s20, %s308_s21  }
  0x15   :  { %26 = vsyncadd [#allocation6], 256  ;;  %s309_s24 = smov [#allocation5]   ;;  %s256_s28 = scalar_lea.hbm %s373_s1, 256 }
  0x16   :  { %s27_s25 = sshll.u32 %s309_s24, 4  ;;  %p257_p8 = scmp.ne.s32.totalorder %s373_s1, %s256_s28  ;;  %s28_s25 = int_to_ptr.vmem [resolvable:$true] %s27_s25 }
  0x17   :  { %p260_p9 = scmp.lt.u32.totalorder %s256_s28, %s373_s1 }
  0x19   :  { %p262_p10 = pnand %p260_p9, %p257_p8 }
  0x1b   :  { %265 = shalt.err (!%p262_p10)
}
  0x1c   :  { %s266_s5 = scalar_lea.vmem %s28_s25, 256  ;;  %s270_s0 = scalar_lea.vmem %s28_s25, 512 }
  0x1d   :  { %p267_p11 = scmp.ne.s32.totalorder %s28_s25, %s266_s5  ;;  %p271_p12 = scmp.lt.s32.totalorder %s28_s25, %s28_s25 }
  0x1e   :  { %p272_p13 = scmp.lt.s32.totalorder %s270_s0, %s266_s5 }
  0x20   :  { %p273_p0 = por %p272_p13, %p271_p12 }
  0x22   :  { %p274_p1 = pnand %p273_p0, %p267_p11 }
  0x24   :  { %277 = shalt.err (!%p274_p1)
}
  0x25   :  { %33 = dma.hbm_to_vmem [thread:$0]  %s373_s1, 256, %s28_s25, [#allocation6], %s307_s20, %s307_s20, %s308_s21  }
  0x26   :  { %300 = dma.done.wait [#allocation3], 512  }
  0x27   :  { %301 = vsyncadd [#allocation3], 4294966784 }
  0x28   :  { %302 = dma.done.wait [#allocation6], 512  }
  0x29   :  { %303 = vsyncadd [#allocation6], 4294966784  ;;  %v111_v0 = vld [vmem:[#allocation2] sm:$0xff]  ;;  %v112_v1 = vld [vmem:[#allocation2 + $0x8] sm:$0xff]  ;;  %v310_v5 = vmov 0.0   ;;  %s311_s1 = smov [#allocation7]  }
  0x2a   :  { %v115_v2 = vld [vmem:[#allocation5] sm:$0xff]  ;;  %v116_v3 = vld [vmem:[#allocation5 + $0x8] sm:$0xff]  ;;  %s203_s8 = sshll.u32 %s311_s1, 4  ;;  %s204_s8 = int_to_ptr.vmem [resolvable:$true] %s203_s8 }
  0x2b   :  { %vm119_vm0 = vcmp.eq.f32.partialorder %v115_v2, 0.0  ;;  %vm123_vm1 = vcmp.eq.f32.partialorder %v115_v2, 1.0  ;;  %vm120_vm2 = vcmp.eq.f32.partialorder %v116_v3, 0.0  ;;  %vm124_vm3 = vcmp.eq.f32.partialorder %v116_v3, 1.0  ;;  %s278_s9 = scalar_lea.vmem %s204_s8, 512  ;;  %p283_p3 = scmp.lt.s32.totalorder %s204_s8, %s204_s8 }
  0x2c   :  { %v151_v4 = vsel %vm119_vm0, %v111_v0, 0.0  ;;  %v224_v6 = vsel %vm119_vm0, 1.0, %v310_v5  ;;  %v152_v7 = vsel %vm120_vm2, %v112_v1, 0.0  ;;  %v225_v8 = vsel %vm120_vm2, 1.0, %v310_v5  ;;  %p279_p2 = scmp.ne.s32.totalorder %s204_s8, %s278_s9  ;;  %p284_p4 = scmp.lt.s32.totalorder %s278_s9, %s278_s9 }
  0x2d   :  { %v171_v9 = vsel %vm123_vm1, %v111_v0, 0.0  ;;  %v172_v10 = vsel %vm124_vm3, %v112_v1, 0.0  ;;  %v155_v11 = vadd.f32 %v152_v7, %v151_v4  ;;  %v167_v12 = vadd.f32 %v225_v8, %v224_v6 }
  0x2e   :  { %v175_v13 = vadd.f32 %v172_v10, %v171_v9  ;;  %v226_v14 = vsel %vm123_vm1, 1.0, %v310_v5  ;;  %v227_v15 = vsel %vm124_vm3, 1.0, %v310_v5  ;;  %p285_p5 = por %p284_p4, %p283_p3 }
  0x2f   :  { %191 = vst [vmem:[#allocation7] sm:$0xff] %v155_v11  ;;  %193 = vst [vmem:[#allocation7 + $0x8] sm:$0xff] %v167_v12  ;;  %v187_v16 = vadd.f32 %v227_v15, %v226_v14 }
  0x30   :  { %195 = vst [vmem:[#allocation7 + $0x10] sm:$0xff] %v175_v13  ;;  %p286_p6 = pnand %p285_p5, %p279_p2 }
  0x31   :  { %197 = vst [vmem:[#allocation7 + $0x18] sm:$0xff] %v187_v16 }
  0x32   :  { %289 = shalt.err (!%p286_p6)
}
  0x33   :  { %s290_s12 = scalar_lea.hbm %s374_s2, 512 }
  0x34   :  { %p291_p7 = scmp.ne.s32.totalorder %s374_s2, %s290_s12  ;;  %p294_p8 = scmp.lt.u32.totalorder %s290_s12, %s374_s2 }
  0x36   :  { %p296_p9 = pnand %p294_p8, %p291_p7 }
  0x38   :  { %299 = shalt.err (!%p296_p9)
}
  0x39   :  { %209 = dma.vmem_to_hbm [thread:$0]  %s204_s8, 512, %s374_s2, [#allocation4], %s307_s20, %s307_s20, %s308_s21  }
  0x3a   :  { %304 = dma.done.wait [#allocation4], 512  }
  0x3b   :  { %305 = vsyncadd [#allocation4], 4294966784 }
  0x3c   :  { %213 = vsyncpa [#allocation3], 1 }
  0x3d   :  { %214 = vsyncpa [#allocation6], 1 }
  0x3e   :  { %215 = vsyncpa [#allocation4], 1 }

</bundles_post_ra>
